<compile_context>
chip_gen: v7x
topology: tpu7x:2x2x1
jax: 0.10.0
libtpu: 0.0.40
codegen_flags: <defaults>
</compile_context>

<pallas_src>
import functools

import jax
import jax.numpy as jnp
from jax.experimental import pallas as pl
from jax.experimental.pallas import tpu as pltpu

LANE = 128  # lane width (minimum batch tile)


def _pick_batch_tile(b_pad, max_tile=2048):
    """Pick the batch tile: as wide as possible (amortize per-step overhead,
    fill the 256-wide MXU), but keep >= 2 grid steps when the padded batch
    allows so both v7x TensorCores get work."""
    tile = min(max_tile, b_pad)
    if b_pad // tile < 2 and b_pad >= 2 * LANE:
        tile = b_pad // 2
    tile = max(LANE, (tile // LANE) * LANE)
    return tile


def lnk_kernel(scal_ref, w_ref, x_ref, hs_ref, out_ref, *, dt):
    """One grid step processes a TB-wide slab of batch elements.

    scal_ref : SMEM (9,)   [bias, ka, kfi, kfr, ksi, ksr, w_act, w_deriv, b_ss]
    w_ref    : VMEM (1, T)   temporal filter
    x_ref    : VMEM (TB, T)  stimulus slab in native (batch, time) layout
    hs_ref   : VMEM (4, TB)  kinetic states (R, A, I1, I2), batch on lanes
    out_ref  : VMEM (8, TB)  rows 0-3 = new states, row 4 = rate, rows 5-7 pad
    """
    # ---- LN stage: temporal filter = single MXU matmul over the time axis ----
    # Contract the time axis of both operands so the result lands with batch on
    # the lane axis: (1, T) x (TB, T)^T -> (1, TB).
    z = jax.lax.dot_general(
        w_ref[...], x_ref[...],
        dimension_numbers=(((1,), (1,)), ((), ())),
        preferred_element_type=jnp.float32,
    )
    z = z + scal_ref[0]
    u = 1.0 / (1.0 + jnp.exp(-z))                       # exact sigmoid (EUP exp)

    # ---- K stage: 4-state Markov channel (R, A, I1, I2), forward Euler -------
    hs = hs_ref[...]                                     # (4, TB)
    R, A, I1, I2 = hs[0:1], hs[1:2], hs[2:3], hs[3:4]    # (1, TB) each
    ka, kfi, kfr = scal_ref[1], scal_ref[2], scal_ref[3]
    ksi, ksr = scal_ref[4], scal_ref[5]
    # TODO(synk): ka_offset / ksr_gain optional Kinetics branches omitted (defaults False).
    fa = ka * u
    dA = fa * R - kfi * A                 # flow into A; equals (A_new - A)/dt exactly
    R_n = R + dt * (kfr * I1 - fa * R)
    A_n = A + dt * dA
    I1_n = I1 + dt * (kfi * A + ksr * I2 - (kfr + ksi) * I1)
    I2_n = I2 + dt * (ksi * I1 - ksr * I2)

    # ---- scale_shift Linear(2 -> 1) on (A_new, dA), then Softplus -------------
    y = scal_ref[6] * A_n + scal_ref[7] * dA + scal_ref[8]          # (1, TB)
    # numerically stable softplus: max(y, 0) + log(1 + exp(-|y|))
    rate = jnp.maximum(y, 0.0) + jnp.log(1.0 + jnp.exp(-jnp.abs(y)))

    # ---- single packed (8, TB) store: one unmasked full-vreg store, one DMA ---
    zero = jnp.zeros_like(rate)
    out_ref[...] = jnp.concatenate(
        [R_n, A_n, I1_n, I2_n, rate, zero, zero, zero], axis=0)


def lnk_forward(x, hs, params, *, dt=0.01, max_tile=2048):
    """x: (B, T) float; hs: (B, 4, 1) float -> (out (B, 1), hs_new (B, 4, 1))."""
    B, T = x.shape
    assert hs.shape == (B, 4, 1)

    b_pad0 = pl.cdiv(B, LANE) * LANE
    TB = _pick_batch_tile(b_pad0, max_tile)
    B_pad = pl.cdiv(B, TB) * TB

    # x stays in its native (B, T) layout; only pad the batch if it doesn't
    # divide the tile (no copy at all in the common divisible case).
    x_f = x.astype(jnp.float32)
    x_in = x_f if B_pad == B else jnp.zeros((B_pad, T), jnp.float32).at[:B].set(x_f)

    # hs is tiny (4 x B): small transpose/pad to put batch on lanes.
    hs_t = jnp.zeros((4, B_pad), jnp.float32).at[:, :B].set(
        hs[:, :, 0].T.astype(jnp.float32))

    w_filt = params["w_filter"].reshape(1, T).astype(jnp.float32)
    w_ss = params["w_ss"].reshape(2).astype(jnp.float32)
    scal = jnp.stack([
        params["bias"].reshape(()),   # LN bias
        params["ka"].reshape(()),     # kinetic rates
        params["kfi"].reshape(()),
        params["kfr"].reshape(()),
        params["ksi"].reshape(()),
        params["ksr"].reshape(()),
        w_ss[0],                      # scale_shift weight on kinetics output (A_new)
        w_ss[1],                      # scale_shift weight on dA/dt
        params["b_ss"].reshape(()),   # scale_shift bias
    ]).astype(jnp.float32)

    kernel = functools.partial(lnk_kernel, dt=float(dt))

    packed = pl.pallas_call(
        kernel,
        grid=(B_pad // TB,),
        in_specs=[
            pl.BlockSpec(memory_space=pltpu.MemorySpace.SMEM),   # packed scalar params
            pl.BlockSpec((1, T), lambda b: (0, 0)),              # temporal filter
            pl.BlockSpec((TB, T), lambda b: (b, 0)),             # x slab, native layout
            pl.BlockSpec((4, TB), lambda b: (0, b)),             # hs slab, batch on lanes
        ],
        out_specs=pl.BlockSpec((8, TB), lambda b: (0, b)),       # states + rate packed
        out_shape=jax.ShapeDtypeStruct((8, B_pad), jnp.float32),
        compiler_params=pltpu.CompilerParams(dimension_semantics=("parallel",)),
    )(scal, w_filt, x_in, hs_t)

    hs_new = packed[0:4, :B].T.reshape(B, 4, 1)
    out = packed[4:5, :B].T                      # (B, 1)
    return out, hs_new


if __name__ == "__main__":
    key = jax.random.PRNGKey(0)
    B = 256          # -> two 128-lane grid steps (keeps both v7x TCs busy)
    T = 40           # filter_len == img_shape[0]
    dt = 0.01

    keys = jax.random.split(key, 6)
    x = jax.random.normal(keys[0], (B, T), jnp.float32)
    hs0 = jax.random.uniform(keys[1], (B, 4, 1), jnp.float32)
    hs0 = hs0 / jnp.sum(hs0, axis=1, keepdims=True)      # state occupancies sum to 1

    params = {
        "w_filter": 0.1 * jax.random.normal(keys[2], (T,), jnp.float32),  # Temperal_Filter
        "bias": jax.random.uniform(keys[3], (1,), jnp.float32),           # LN bias
        "ka": jnp.array([0.5], jnp.float32),                              # kinetic rates
        "kfi": jnp.array([0.3], jnp.float32),
        "kfr": jnp.array([0.2], jnp.float32),
        "ksi": jnp.array([0.1], jnp.float32),
        "ksr": jnp.array([0.05], jnp.float32),
        "w_ss": 0.5 * jax.random.normal(keys[4], (1, 2), jnp.float32),    # Linear(2, 1).weight
        "b_ss": 0.1 * jax.random.normal(keys[5], (1,), jnp.float32),      # Linear(2, 1).bias
    }

    fwd = jax.jit(functools.partial(lnk_forward, dt=dt))
    out, hs_new = fwd(x, hs0, params)
    jax.block_until_ready((out, hs_new))
    assert out.shape == (B, 1)
    assert hs_new.shape == (B, 4, 1)
    assert bool(jnp.all(jnp.isfinite(out))) and bool(jnp.all(jnp.isfinite(hs_new)))
    print("KERNEL_OK")
</pallas_src>

<mosaic_0001>
module attributes {stable_mosaic.version = 11 : i64} {
  func.func @lnk_kernel(%arg0: i32, %arg1: memref<9xf32, #tpu.memory_space<smem>>, %arg2: memref<1x40xf32, #tpu.memory_space<vmem>>, %arg3: memref<128x40xf32, #tpu.memory_space<vmem>>, %arg4: memref<4x128xf32, #tpu.memory_space<vmem>>, %arg5: memref<8x128xf32, #tpu.memory_space<vmem>>) attributes {dimension_semantics = [#tpu.dimension_semantics<parallel>], iteration_bounds = array<i64: 2>, scalar_prefetch = 0 : i64, scratch_operands = 0 : i64, tpu.core_type = #tpu.core_type<tc>, window_params = [{transform_indices = @transform_0, window_bounds = array<i64: 9>}, {pipeline_mode = #tpu.pipeline_mode<synchronous>, transform_indices = @transform_1, window_bounds = array<i64: 1, 40>}, {transform_indices = @transform_2, window_bounds = array<i64: 128, 40>}, {transform_indices = @transform_3, window_bounds = array<i64: 4, 128>}, {transform_indices = @transform_4, window_bounds = array<i64: 8, 128>}]} {
    %c0 = arith.constant 0 : index
    %c0_0 = arith.constant 0 : index
    %0 = vector.load %arg2[%c0, %c0_0] : memref<1x40xf32, #tpu.memory_space<vmem>>, vector<1x40xf32>
    %c0_1 = arith.constant 0 : index
    %c0_2 = arith.constant 0 : index
    %1 = vector.load %arg3[%c0_1, %c0_2] : memref<128x40xf32, #tpu.memory_space<vmem>>, vector<128x40xf32>
    %cst = arith.constant dense<0.000000e+00> : vector<1x128xf32>
    %2 = tpu.matmul %0, %1, %cst {dimension_numbers = #tpu.dot_dimension_numbers<[1], [1], [0], [0], [0, 0, 1, 0], [], []>} : vector<1x40xf32>, vector<128x40xf32>, vector<1x128xf32> -> vector<1x128xf32>
    %c0_3 = arith.constant 0 : index
    %3 = memref.load %arg1[%c0_3] : memref<9xf32, #tpu.memory_space<smem>>
    %4 = vector.broadcast %3 : f32 to vector<1x128xf32>
    %5 = arith.addf %2, %4 : vector<1x128xf32>
    %cst_4 = arith.constant 0.000000e+00 : f32
    %6 = vector.broadcast %cst_4 : f32 to vector<1x128xf32>
    %7 = arith.subf %6, %5 : vector<1x128xf32>
    %8 = math.exp %7 : vector<1x128xf32>
    %cst_5 = arith.constant 1.000000e+00 : f32
    %9 = vector.broadcast %cst_5 : f32 to vector<1x128xf32>
    %10 = arith.addf %9, %8 : vector<1x128xf32>
    %cst_6 = arith.constant 1.000000e+00 : f32
    %11 = vector.broadcast %cst_6 : f32 to vector<1x128xf32>
    %12 = arith.divf %11, %10 : vector<1x128xf32>
    %c0_7 = arith.constant 0 : index
    %c0_8 = arith.constant 0 : index
    %13 = vector.load %arg4[%c0_7, %c0_8] : memref<4x128xf32, #tpu.memory_space<vmem>>, vector<4x128xf32>
    %14 = vector.extract_strided_slice %13 {offsets = [0, 0], sizes = [1, 128], strides = [1, 1]} : vector<4x128xf32> to vector<1x128xf32>
    %15 = vector.extract_strided_slice %13 {offsets = [1, 0], sizes = [1, 128], strides = [1, 1]} : vector<4x128xf32> to vector<1x128xf32>
    %16 = vector.extract_strided_slice %13 {offsets = [2, 0], sizes = [1, 128], strides = [1, 1]} : vector<4x128xf32> to vector<1x128xf32>
    %17 = vector.extract_strided_slice %13 {offsets = [3, 0], sizes = [1, 128], strides = [1, 1]} : vector<4x128xf32> to vector<1x128xf32>
    %c1 = arith.constant 1 : index
    %18 = memref.load %arg1[%c1] : memref<9xf32, #tpu.memory_space<smem>>
    %c2 = arith.constant 2 : index
    %19 = memref.load %arg1[%c2] : memref<9xf32, #tpu.memory_space<smem>>
    %c3 = arith.constant 3 : index
    %20 = memref.load %arg1[%c3] : memref<9xf32, #tpu.memory_space<smem>>
    %c4 = arith.constant 4 : index
    %21 = memref.load %arg1[%c4] : memref<9xf32, #tpu.memory_space<smem>>
    %c5 = arith.constant 5 : index
    %22 = memref.load %arg1[%c5] : memref<9xf32, #tpu.memory_space<smem>>
    %23 = vector.broadcast %18 : f32 to vector<1x128xf32>
    %24 = arith.mulf %23, %12 : vector<1x128xf32>
    %25 = arith.mulf %24, %14 : vector<1x128xf32>
    %26 = vector.broadcast %19 : f32 to vector<1x128xf32>
    %27 = arith.mulf %26, %15 : vector<1x128xf32>
    %28 = arith.subf %25, %27 : vector<1x128xf32>
    %29 = vector.broadcast %20 : f32 to vector<1x128xf32>
    %30 = arith.mulf %29, %16 : vector<1x128xf32>
    %31 = arith.mulf %24, %14 : vector<1x128xf32>
    %32 = arith.subf %30, %31 : vector<1x128xf32>
    %cst_9 = arith.constant 0.00999999977 : f32
    %33 = vector.broadcast %cst_9 : f32 to vector<1x128xf32>
    %34 = arith.mulf %33, %32 : vector<1x128xf32>
    %35 = arith.addf %14, %34 : vector<1x128xf32>
    %cst_10 = arith.constant 0.00999999977 : f32
    %36 = vector.broadcast %cst_10 : f32 to vector<1x128xf32>
    %37 = arith.mulf %36, %28 : vector<1x128xf32>
    %38 = arith.addf %15, %37 : vector<1x128xf32>
    %39 = vector.broadcast %19 : f32 to vector<1x128xf32>
    %40 = arith.mulf %39, %15 : vector<1x128xf32>
    %41 = vector.broadcast %22 : f32 to vector<1x128xf32>
    %42 = arith.mulf %41, %17 : vector<1x128xf32>
    %43 = arith.addf %40, %42 : vector<1x128xf32>
    %44 = arith.addf %20, %21 : f32
    %45 = vector.broadcast %44 : f32 to vector<1x128xf32>
    %46 = arith.mulf %45, %16 : vector<1x128xf32>
    %47 = arith.subf %43, %46 : vector<1x128xf32>
    %cst_11 = arith.constant 0.00999999977 : f32
    %48 = vector.broadcast %cst_11 : f32 to vector<1x128xf32>
    %49 = arith.mulf %48, %47 : vector<1x128xf32>
    %50 = arith.addf %16, %49 : vector<1x128xf32>
    %51 = vector.broadcast %21 : f32 to vector<1x128xf32>
    %52 = arith.mulf %51, %16 : vector<1x128xf32>
    %53 = vector.broadcast %22 : f32 to vector<1x128xf32>
    %54 = arith.mulf %53, %17 : vector<1x128xf32>
    %55 = arith.subf %52, %54 : vector<1x128xf32>
    %cst_12 = arith.constant 0.00999999977 : f32
    %56 = vector.broadcast %cst_12 : f32 to vector<1x128xf32>
    %57 = arith.mulf %56, %55 : vector<1x128xf32>
    %58 = arith.addf %17, %57 : vector<1x128xf32>
    %c6 = arith.constant 6 : index
    %59 = memref.load %arg1[%c6] : memref<9xf32, #tpu.memory_space<smem>>
    %60 = vector.broadcast %59 : f32 to vector<1x128xf32>
    %61 = arith.mulf %60, %38 : vector<1x128xf32>
    %c7 = arith.constant 7 : index
    %62 = memref.load %arg1[%c7] : memref<9xf32, #tpu.memory_space<smem>>
    %63 = vector.broadcast %62 : f32 to vector<1x128xf32>
    %64 = arith.mulf %63, %28 : vector<1x128xf32>
    %65 = arith.addf %61, %64 : vector<1x128xf32>
    %c8 = arith.constant 8 : index
    %66 = memref.load %arg1[%c8] : memref<9xf32, #tpu.memory_space<smem>>
    %67 = vector.broadcast %66 : f32 to vector<1x128xf32>
    %68 = arith.addf %65, %67 : vector<1x128xf32>
    %cst_13 = arith.constant 0.000000e+00 : f32
    %69 = vector.broadcast %cst_13 : f32 to vector<1x128xf32>
    %70 = arith.maximumf %68, %69 : vector<1x128xf32>
    %71 = math.absf %68 : vector<1x128xf32>
    %cst_14 = arith.constant 0.000000e+00 : f32
    %72 = vector.broadcast %cst_14 : f32 to vector<1x128xf32>
    %73 = arith.subf %72, %71 : vector<1x128xf32>
    %74 = math.exp %73 : vector<1x128xf32>
    %cst_15 = arith.constant 1.000000e+00 : f32
    %75 = vector.broadcast %cst_15 : f32 to vector<1x128xf32>
    %76 = arith.addf %75, %74 : vector<1x128xf32>
    %77 = math.log %76 : vector<1x128xf32>
    %78 = arith.addf %70, %77 : vector<1x128xf32>
    %cst_16 = arith.constant 0.000000e+00 : f32
    %79 = vector.broadcast %cst_16 : f32 to vector<1x128xf32>
    %80 = tpu.concatenate %35, %38, %50, %58, %78, %79, %79, %79 in 0 : vector<1x128xf32>, vector<1x128xf32>, vector<1x128xf32>, vector<1x128xf32>, vector<1x128xf32>, vector<1x128xf32>, vector<1x128xf32>, vector<1x128xf32> -> vector<8x128xf32>
    %c0_17 = arith.constant 0 : index
    %c0_18 = arith.constant 0 : index
    %81 = vector.load %arg5[%c0_17, %c0_18] : memref<8x128xf32, #tpu.memory_space<vmem>>, vector<8x128xf32>
    tpu.vector_store %arg5[%c0_17, %c0_18], %80 {strides = array<i32>} : memref<8x128xf32, #tpu.memory_space<vmem>>, vector<8x128xf32>,
    return
  }
  func.func @transform_0(%arg0: i32) -> i32 {
    %c0_i32 = arith.constant 0 : i32
    %c0_i32_0 = arith.constant 0 : i32
    return %c0_i32 : i32
  }
  func.func @transform_1(%arg0: i32) -> (i32, i32) {
    %c0_i32 = arith.constant 0 : i32
    %c0_i32_0 = arith.constant 0 : i32
    %c0_i32_1 = arith.constant 0 : i32
    return %c0_i32, %c0_i32_0 : i32, i32
  }
  func.func @transform_2(%arg0: i32) -> (i32, i32) {
    %c0_i32 = arith.constant 0 : i32
    %c0_i32_0 = arith.constant 0 : i32
    return %arg0, %c0_i32 : i32, i32
  }
  func.func @transform_3(%arg0: i32) -> (i32, i32) {
    %c0_i32 = arith.constant 0 : i32
    %c0_i32_0 = arith.constant 0 : i32
    return %c0_i32, %arg0 : i32, i32
  }
  func.func @transform_4(%arg0: i32) -> (i32, i32) {
    %c0_i32 = arith.constant 0 : i32
    %c0_i32_0 = arith.constant 0 : i32
    return %c0_i32, %arg0 : i32, i32
  }
}

</mosaic_0001>

<bundles_post_ra>
// kernel: lnk_forward.1
= control target key start
LH: loop header
LB: loop body
LE: loop exit
PB: predicated region body
PF: predicated region fallthrough
CT: control target
= control target key end

     0   :  { %9 = vsyncpa [#allocation3], 0  ;;  %s760_s15 = smov 0   ;;  %s863_s0 = inlined_call_operand.vmem [shape: f32[9], index: 0, kind: input, shape index: {}]   ;;  %s864_s1 = inlined_call_operand.vmem [shape: f32[1,40], index: 1, kind: input, shape index: {}]   ;;  %s865_s2 = inlined_call_operand.vmem [shape: f32[256,40], index: 2, kind: input, shape index: {}]   ;;  %s866_s3 = inlined_call_operand.vmem [shape: f32[4,256], index: 3, kind: input, shape index: {}]   ;;  %s867_s4 = inlined_call_operand.vmem [shape: f32[8,256], index: 4, kind: output, shape index: {}]  }
   0x1 LB: > { %s766_s16 = sadd.s32 4294967295, %s729_s15   ;;  %p554_p0 = scmp.ge.s32.totalorder %s729_s15, 1  ;;  %s729_s15 = sphi %s760_s15, %s15_s15  }
   0x2   : > { %p140_p1 = scmp.lt.s32.totalorder %s729_s15, 3  ;;  %s153_s19 = sshll.u32 %s863_s0, 4  ;;  %s154_s19 = int_to_ptr.vmem [resolvable:$true] %s153_s19 }
   0x3   : > { %p682_p3 = scmp.eq.s32.totalorder %s766_s16, 0  ;;  %s704_s21 = scalar_lea.vmem %s154_s19, 16 }
   0x4   : > { %p773_p2 = pnand %p554_p0, %p140_p1  ;;  %p705_p6 = scmp.ne.s32.totalorder %s154_s19, %s704_s21 }
   0x5   : > { %p712_p10 = scmp.lt.s32.totalorder %s154_s19, %s154_s19  ;;  %p713_p11 = scmp.lt.s32.totalorder %s704_s21, %s704_s21 }
   0x6   : > { %p678_p4 = pneg %p773_p2 }
   0x7   : > { %p714_p12 = por %p713_p11, %p712_p10 }
   0x8   : > { %p679_p5 = pnand %p682_p3, %p678_p4 }
   0xa   : > { %p706_p7 = pneg %p679_p5 }
   0xc   : > { %p707_p8 = pnand %p706_p7, %p705_p6 }
   0xe   : > { %p708_p9 = pneg %p707_p8 }
  0x10   : > { %p715_p13 = pnand %p714_p12, %p708_p9 }
  0x12   : > { %718 = shalt.err (!%p715_p13)
}
  0x13   : > { %s731_s22 = smov [#allocation2]   ;;  %185 = sbr.rel (%p773_p2) target bundleno = 402 (0x192), region = 36 }
  0x14   : > { %681 = dma.vmem_to_smem (!%p679_p5), %s154_s19, 16, %s731_s22, [#allocation3]  }
  0x1a   : > { %724 = dma.done.wait (%p682_p3), [#allocation3], 16  }
  0x1b   : > { %726 = vsyncadd (%p682_p3), [#allocation3], 4294967280 }
  0x1c   : > { %191 = sfence }
  0x1d   : > { %s559_s23 = sshll.u32 %s766_s16, 4  ;;  %v732_v0 = vmov 0.0|0.0   ;;  %vm733_vm0 = vmmov 0   ;;  %v734_v1 = vmov 0.0   ;;  %vm248_vm1 = vcmask 326656   ;;  %s246_s30 = sld [smem:[#allocation2]] }
  0x1e   : > { %642 = vmatprep.subr.bf16.mxu0 %v732_v0  ;;  %p216_p0 = scmp.lt.s32.totalorder %s559_s23, 31  ;;  %639 = vmatprep.mubr.msk.f32.mxu0 %vm733_vm0, %v734_v1  ;;  %vm798_vm2 = vmpackc.low %vm248_vm1, %vm248_vm1  ;;  %v229_v27 = vld [vmem:[%s864_s1] sm:$0x1]  ;;  %p221_p1 = scmp.lt.s32.totalorder %s766_s16, 1  ;;  %vm460_vm3 = vcmask 1040384   ;;  %vm462_vm4 = vcmask 1041408  }
  0x1f   : > { %s581_s5 = sld [smem:[#allocation2 + $0x2]]  ;;  %s580_s7 = sld [smem:[#allocation2 + $0x1]]  ;;  %vm464_vm5 = vcmask 1042432   ;;  %vm466_vm6 = vcmask 1043456   ;;  %vm468_vm7 = vcmask 1044480   ;;  %vm470_vm8 = vcmask 1045504  }
  0x20   : > { %s872_s23 = smov (!%p216_p0, %s559_s23), 31  ;;  %s874_s16 = smov (!%p221_p1, %s766_s16), 1  ;;  %vm472_vm9 = vcmask 1046528  }
  0x21   : > { %s560_s24 = sshll.u32 %s872_s23, 3  ;;  %s561_s6 = sshll.u32 %s874_s16, 2 }
  0x22   : > { %s792_s27 = scalar_lea.vmem %s865_s2, %s560_s24  ;;  %s224_s10 = scalar_lea.vmem %s866_s3, %s561_s6 }
  0x23   : > { %v230_v2 = vld [vmem:[%s792_s27] sm:$0xff]  ;;  %v231_v3 = vld [vmem:[%s792_s27 + $0x8] sm:$0xff]  ;;  %v232_v6 = vld [vmem:[%s792_s27 + $0x10] sm:$0xff]  ;;  %v247_v28 = vstv %s246_s30  ;;  %s586_s11 = sld [smem:[#allocation2 + $0x7]]  ;;  %s585_s12 = sld [smem:[#allocation2 + $0x6]] }
  0x24   : > { %v643_v5 = vpack.c.bf16 %v231_v3, %v230_v2  ;;  %v233_v7 = vld [vmem:[%s792_s27 + $0x18] sm:$0xff]  ;;  %v234_v9 = vld [vmem:[%s792_s27 + $0x20] sm:$0xff]  ;;  %v235_v10 = vld [vmem:[%s792_s27 + $0x28] sm:$0xff]  ;;  %s587_s13 = sld [smem:[#allocation2 + $0x8]]  ;;  %s582_s14 = sld [smem:[#allocation2 + $0x3]] }
  0x25   : > { %v647_v8 = vpack.c.bf16 %v233_v7, %v232_v6  ;;  %v651_v11 = vpack.c.bf16 %v235_v10, %v234_v9  ;;  %v236_v12 = vld [vmem:[%s792_s27 + $0x30] sm:$0xff]  ;;  %v237_v13 = vld [vmem:[%s792_s27 + $0x38] sm:$0xff]  ;;  %v238_v15 = vld [vmem:[%s792_s27 + $0x40] sm:$0xff]  ;;  %v385_v37 = vstv %s581_s5  ;;  %s583_s17 = sld [smem:[#allocation2 + $0x4]]  ;;  %s584_s18 = sld [smem:[#allocation2 + $0x5]] }
  0x26   : > { %645 = vmatpush3.bf16.xpose.msk.msra.mxu0 %vm798_vm2, %v643_v5  ;;  %v655_v14 = vpack.c.bf16 %v237_v13, %v236_v12  ;;  %v239_v16 = vld [vmem:[%s792_s27 + $0x48] sm:$0xff]  ;;  %v240_v18 = vld [vmem:[%s792_s27 + $0x50] sm:$0xff]  ;;  %v241_v19 = vld [vmem:[%s792_s27 + $0x58] sm:$0xff]  ;;  %v382_v39 = vstv %s580_s7  ;;  %s562_s20 = sshll.u32 %s874_s16, 3 }
  0x27   : > { %646 = vmatprep.subr.bf16.mxu0 %v732_v0  ;;  %v659_v17 = vpack.c.bf16 %v239_v16, %v238_v15  ;;  %v663_v20 = vpack.c.bf16 %v241_v19, %v240_v18  ;;  %v242_v21 = vld [vmem:[%s792_s27 + $0x60] sm:$0xff]  ;;  %v243_v22 = vld [vmem:[%s792_s27 + $0x68] sm:$0xff]  ;;  %v244_v24 = vld [vmem:[%s792_s27 + $0x70] sm:$0xff]  ;;  %s228_s23 = scalar_lea.vmem %s867_s4, %s562_s20 }
  0x28   : > { %v667_v23 = vpack.c.bf16 %v243_v22, %v242_v21  ;;  %v245_v25 = vld [vmem:[%s792_s27 + $0x78] sm:$0xff]  ;;  %v844_v36 = vld [vmem:[%s224_s10] sm:$0xf] }
  0x29   : > { %v671_v26 = vpack.c.bf16 %v245_v25, %v244_v24  ;;  %v386_v38 = vmul.f32 %v385_v37, %v844_v36  ;;  %v439_v45 = vstv %s586_s11  ;;  %v436_v49 = vstv %s585_s12 }
  0x2a   : > { %v446_v53 = vstv %s587_s13  ;;  %v391_v62 = vstv %s582_s14 }
  0x2b   : > { %v388_v42 = vrot.slane %v386_v38, 1  ;;  %v407_v57 = vstv %s584_s18  ;;  %s413_s19 = sadd.f32 %s583_s17, %s582_s14  ;;  %v392_v1 = vmul.f32 %v391_v62, %v844_v36  ;;  %v425_v5 = vstv %s583_s17 }
  0x2c   : > { %v408_v59 = vmul.f32 %v407_v57, %v844_v36  ;;  %v426_v7 = vmul.f32 %v425_v5, %v844_v36 }
  0x2d   : > { %v414_v61 = vstv %s413_s19 }
  0x2e   : > { %649 = vmatpush3.bf16.xpose.msk.msra.mxu0 %vm798_vm2, %v647_v8  ;;  %v410_v63 = vrot.slane %v408_v59, 2  ;;  %v427_v8 = vrot.slane %v408_v59, 1 }
  0x2f   : > { %650 = vmatprep.subr.bf16.mxu0 %v732_v0 }
  0x30   : > { %v412_v3 = vadd.f32 %v410_v63, %v386_v38  ;;  %v429_v13 = vsub.f32 %v426_v7, %v427_v8 }
  0x32   : > { %v430_v16 = vmul.f32 0.01, %v429_v13 }
  0x34   : > { %v432_v19 = vrot.slane %v430_v16, 7 }
  0x36   : > { %653 = vmatpush3.bf16.xpose.msk.msra.mxu0 %vm798_vm2, %v651_v11  ;;  %v434_v25 = vadd.f32 %v432_v19, %v844_v36 }
  0x37   : > { %654 = vmatprep.subr.bf16.mxu0 %v732_v0 }
  0x3e   : > { %657 = vmatpush3.bf16.xpose.msk.msra.mxu0 %vm798_vm2, %v655_v14 }
  0x3f   : > { %658 = vmatprep.subr.bf16.mxu0 %v732_v0 }
  0x46   : > { %661 = vmatpush3.bf16.xpose.msk.msra.mxu0 %vm798_vm2, %v659_v17 }
  0x47   : > { %662 = vmatprep.subr.bf16.mxu0 %v732_v0 }
  0x4e   : > { %665 = vmatpush3.bf16.xpose.msk.msra.mxu0 %vm798_vm2, %v663_v20 }
  0x4f   : > { %666 = vmatprep.subr.bf16.mxu0 %v732_v0 }
  0x56   : > { %669 = vmatpush3.bf16.xpose.msk.msra.mxu0 %vm798_vm2, %v667_v23 }
  0x57   : > { %670 = vmatprep.subr.bf16.mxu0 %v732_v0  ;;  %v415_v0 = vmul.f32 %v414_v61, %v844_v36 }
  0x59   : > { %v417_v4 = vrot.slane %v415_v0, 1 }
  0x5b   : > { %v419_v10 = vsub.f32 %v412_v3, %v417_v4 }
  0x5d   : > { %v420_v14 = vmul.f32 0.01, %v419_v10 }
  0x5e   : > { %673 = vmatpush3.bf16.xpose.msk.msra.mxu0 %vm798_vm2, %v671_v26 }
  0x5f   : > { %v422_v17 = vrot.slane %v420_v14, 7 }
  0x61   : > { %v424_v20 = vadd.f32 %v422_v17, %v844_v36 }
  0x65   : > { %640 = vmatmul.mubr.msk.f32.vlgmr.msra.gmra.mrb[0].mxu0 %vm248_vm1, %v229_v27 }
 0x138   : > { %v366_v29 = vpop.f32.mrb[0].mxu0 }
 0x139   : > { %v367_v30 = vadd.f32 %v366_v29, %v247_v28  ;;  %v641_v31 = vpop.f32.mrb[1].mxu0 }
 0x13b   : > { %v370_v32 = vsub.f32 0.0, %v367_v30 }
 0x13d   : > { %v371_v33 = vmul.f32 1.442695, %v370_v32 }
 0x13f   : > { %696 = vpow2.f32 %v371_v33 }
 0x149   : > { %v697_v34 = vpop.eup %696 }
 0x14a   : > { %v373_v35 = vadd.f32 1.0, %v697_v34 }
 0x14c   : > { %698 = vrcp.f32 %v373_v35 }
 0x156   : > { %v699_v40 = vpop.eup %698 }
 0x157   : > { %v383_v41 = vmul.f32 %v699_v40, %v382_v39 }
 0x159   : > { %v384_v43 = vmul.f32 %v383_v41, %v844_v36 }
 0x15b   : > { %v390_v44 = vsub.f32 %v384_v43, %v388_v42  ;;  %v394_v2 = vrot.slane %v384_v43, 6 }
 0x15d   : > { %v402_v46 = vmul.f32 0.01, %v390_v44  ;;  %v440_v48 = vmul.f32 %v439_v45, %v390_v44  ;;  %v396_v6 = vsub.f32 %v392_v1, %v394_v2 }
 0x15f   : > { %v404_v47 = vrot.slane %v402_v46, 7  ;;  %v442_v52 = vrot.slane %v440_v48, 7  ;;  %v397_v11 = vmul.f32 0.01, %v396_v6 }
 0x161   : > { %v406_v50 = vadd.f32 %v404_v47, %v844_v36  ;;  %v399_v15 = vrot.slane %v397_v11, 2 }
 0x163   : > { %v437_v51 = vmul.f32 %v436_v49, %v406_v50  ;;  %v401_v18 = vadd.f32 %v399_v15, %v844_v36 }
 0x165   : > { %v444_v54 = vadd.f32 %v442_v52, %v437_v51  ;;  %v461_v22 = vsel %vm460_vm3, %v401_v18, %v406_v50 }
 0x166   : > { %v463_v27 = vsel %vm462_vm4, %v461_v22, %v424_v20 }
 0x167   : > { %v447_v55 = vadd.f32 %v446_v53, %v444_v54  ;;  %v465_v29 = vsel %vm464_vm5, %v463_v27, %v434_v25 }
 0x169   : > { %v449_v56 = vand.u32 2147483647, %v447_v55  ;;  %v448_v23 = vmax.f32 %v447_v55, 0.0 }
 0x16b   : > { %v450_v58 = vsub.f32 0.0, %v449_v56 }
 0x16d   : > { %v451_v60 = vmul.f32 1.442695, %v450_v58 }
 0x16f   : > { %700 = vpow2.f32 %v451_v60 }
 0x179   : > { %v701_v9 = vpop.eup %700 }
 0x17a   : > { %v453_v12 = vadd.f32 1.0, %v701_v9 }
 0x17c   : > { %702 = vlog2.f32 %v453_v12 }
 0x186   : > { %v703_v21 = vpop.eup %702 }
 0x187   : > { %v455_v24 = vmul.f32 0.6931472, %v703_v21 }
 0x189   : > { %v456_v26 = vadd.f32 %v455_v24, %v448_v23 }
 0x18b   : > { %v458_v28 = vrot.slane %v456_v26, 5 }
 0x18d   : > { %v467_v30 = vsel %vm466_vm6, %v465_v29, %v458_v28 }
 0x18e   : > { %v469_v31 = vsel %vm468_vm7, %v467_v30, 0.0 }
 0x18f   : > { %v471_v32 = vsel %vm470_vm8, %v469_v31, 0.0 }
 0x190   : > { %v473_v33 = vsel %vm472_vm9, %v471_v32, 0.0 }
 0x191   : > { %474 = vst [vmem:[%s228_s23] sm:$0xff] %v473_v33 }
 0x192 PF: > { %s15_s15 = sadd.s32 1, %s729_s15  }
 0x193   : > { %p12_p2 = scmp.ge.s32.totalorder %s15_s15, 4  }
 0x195   :  { %14 = sbr.rel (!%p12_p2) target bundleno = 1 (0x1), region = 74 }
 0x19c   :  { %494 = vsyncpa [#allocation3], 1 }
 0x19d   :  { %496 = vsyncpa [#allocation3 + $0x1], 1 }

</bundles_post_ra>
